<compile_context>
chip_gen: v5e
topology: v5e:2x2
jax: 0.10.0
libtpu: 0.0.40
codegen_flags: <defaults>
</compile_context>

<pallas_src>
import math

import jax
import jax.numpy as jnp
from jax.experimental import pallas as pl
from jax.experimental.pallas import tpu as pltpu


def _round_up(x, m):
    return ((x + m - 1) // m) * m


# ----------------------------- fused kernel ---------------------------------


def _fused_policy_kernel(freqs_ref, expand_ref, t_ref, act_ref, state_ref,
                         tw1s_ref, tw1c_ref, tb1_ref, tw2_ref, tb2_ref,
                         mwa_ref, mwt_ref, mws_ref, mb1_ref,
                         mw2_ref, mb2_ref, fw_ref, fb_ref,
                         o_ref):
    """One grid step == one block of E_BLK envs (R_BLK = E_BLK * n_actions rows).

    freqs_ref:  (1, half)           resident VMEM (sinusoidal frequency table)
    expand_ref: (R_BLK, E_BLK)      resident VMEM one-hot row->env expansion
    t_ref:      (E_BLK, 1)          per-block time values
    act_ref:    (R_BLK, action_dim) per-block action rows (env-major)
    state_ref:  (E_BLK, state_feat_dim)
    o_ref:      (R_BLK, out_lanes)  out_lanes is a 128 multiple (lane-dense)
    Weights are whole-array resident VMEM refs; m_w1 arrives pre-split as
    (W_action, W_time, W_state) matching the original concat order.
    """
    # ---- SinusoidalPosEmb batched over the env block: (E_BLK, half) ----
    emb = t_ref[...] * freqs_ref[...]                      # (E,1)*(1,half)
    sin_e = jnp.sin(emb)
    cos_e = jnp.cos(emb)

    # ---- time_mlp: cat([sin, cos]) @ W1 == sin @ W1[:half] + cos @ W1[half:]
    h_t = jnp.tanh(
        jnp.dot(sin_e, tw1s_ref[...], preferred_element_type=jnp.float32)
        + jnp.dot(cos_e, tw1c_ref[...], preferred_element_type=jnp.float32)
        + tb1_ref[...])
    t_embed = (jnp.dot(h_t, tw2_ref[...], preferred_element_type=jnp.float32)
               + tb2_ref[...])                              # (E, time_dim)

    # ---- per-env contribution of [t_embed, state] to the first mid layer ----
    env_bias = (jnp.dot(t_embed, mwt_ref[...], preferred_element_type=jnp.float32)
                + jnp.dot(state_ref[...], mws_ref[...], preferred_element_type=jnp.float32)
                + mb1_ref[...])                             # (E, 64)

    # ---- expand per-env bias to per-row (exact: one-hot matmul on idle MXU) ----
    bias_rows = jnp.dot(expand_ref[...], env_bias,
                        preferred_element_type=jnp.float32)  # (R, 64)

    # ---- mid_layer + final_layer on the whole row block ----
    h1 = jnp.tanh(
        jnp.dot(act_ref[...], mwa_ref[...], preferred_element_type=jnp.float32)
        + bias_rows)                                        # (R, 64)
    h2 = jnp.tanh(
        jnp.dot(h1, mw2_ref[...], preferred_element_type=jnp.float32)
        + mb2_ref[...])                                     # (R, 64)
    o_ref[...] = (jnp.dot(h2, fw_ref[...], preferred_element_type=jnp.float32)
                  + fb_ref[...])                            # (R, out_lanes)


# ----------------------------- parameters -----------------------------------


def init_params(key, action_dim, state_feat_dim, time_dim=16):
    """torch.nn.Linear-style init: U(-1/sqrt(fan_in), 1/sqrt(fan_in))."""
    def linear(k, fan_in, fan_out):
        kw, kb = jax.random.split(k)
        bound = 1.0 / math.sqrt(fan_in)
        w = jax.random.uniform(kw, (fan_in, fan_out), jnp.float32, -bound, bound)
        b = jax.random.uniform(kb, (1, fan_out), jnp.float32, -bound, bound)
        return w, b

    keys = jax.random.split(key, 5)
    d_in = state_feat_dim + action_dim + time_dim
    p = {}
    p["t_w1"], p["t_b1"] = linear(keys[0], time_dim, time_dim * 2)
    p["t_w2"], p["t_b2"] = linear(keys[1], time_dim * 2, time_dim)
    p["m_w1"], p["m_b1"] = linear(keys[2], d_in, 64)
    p["m_w2"], p["m_b2"] = linear(keys[3], 64, 64)
    p["f_w"], p["f_b"] = linear(keys[4], 64, action_dim)
    return p


def prepare_kernel_params(params, action_dim, time_dim=16):
    """One-time re-layout of torch-style params for the fused kernel.

    - t_w1 split into sin/cos halves (replaces in-kernel concat).
    - m_w1 split into action/time/state row blocks (matches concat order
      [action, t_embed, state]).
    - final layer zero-padded to a 128-lane-multiple output width so the
      kernel's writeback is lane-dense.
    """
    half = time_dim // 2
    out_lanes = max(128, _round_up(action_dim, 128))
    pad = out_lanes - params["f_w"].shape[-1]
    return {
        "tw1_sin": params["t_w1"][:half],
        "tw1_cos": params["t_w1"][half:],
        "t_b1": params["t_b1"],
        "t_w2": params["t_w2"],
        "t_b2": params["t_b2"],
        "m_wa": params["m_w1"][:action_dim],
        "m_wt": params["m_w1"][action_dim:action_dim + time_dim],
        "m_ws": params["m_w1"][action_dim + time_dim:],
        "m_b1": params["m_b1"],
        "m_w2": params["m_w2"],
        "m_b2": params["m_b2"],
        "f_w_pad": jnp.pad(params["f_w"], ((0, 0), (0, pad))),
        "f_b_pad": jnp.pad(params["f_b"], ((0, 0), (0, pad))),
    }


# ----------------------------- forward --------------------------------------


_WEIGHT_ORDER = ("tw1_sin", "tw1_cos", "t_b1", "t_w2", "t_b2",
                 "m_wa", "m_wt", "m_ws", "m_b1", "m_w2", "m_b2",
                 "f_w_pad", "f_b_pad")


def _choose_env_block(n_env, n_actions, target_rows):
    """Pick E_BLK (envs per grid step): multiple of 8 so every block is
    sublane-dense, sized toward `target_rows` rows/step, and small enough to
    give >=2 grid steps (megacore on v7x) whenever n_env allows it."""
    e_blk = max(8, ((target_rows // max(n_actions, 1)) // 8) * 8)
    if n_env > 8:
        e_blk = min(e_blk, max(8, _round_up(pl.cdiv(n_env, 2), 8)))
    else:
        e_blk = min(e_blk, 8)
    return e_blk


def networks_forward(kp, action, time, state, time_dim=16, target_rows=512):
    # NOTE: target_rows ~256-512 suits v6e/v7x; ~128-256 is plenty on v5e.
    n_env, n_actions, action_dim = action.shape
    state_feat_dim = state.shape[-1]
    half = time_dim // 2
    out_lanes = kp["f_w_pad"].shape[-1]
    d_hidden = kp["m_w2"].shape[0]

    e_blk = _choose_env_block(n_env, n_actions, target_rows)
    n_blocks = pl.cdiv(n_env, e_blk)
    n_env_pad = n_blocks * e_blk
    r_blk = e_blk * n_actions                 # rows per grid step (mult of 8)
    n_rows_pad = n_env_pad * n_actions
    pad_e = n_env_pad - n_env

    f32 = jnp.float32
    t2d = jnp.pad(time.astype(f32).reshape(n_env, 1), ((0, pad_e), (0, 0)))
    act_rows = jnp.pad(action.astype(f32),
                       ((0, pad_e), (0, 0), (0, 0))).reshape(n_rows_pad, action_dim)
    state2d = jnp.pad(state.astype(f32).reshape(n_env, state_feat_dim),
                      ((0, pad_e), (0, 0)))

    # Small resident tables (pure functions of static shapes -> constant-folded
    # under jit).  log_scale matches the reference (time_dim==2 would divide
    # by zero, as in the original module).
    log_scale = math.log(10000.0) / (half - 1)
    freqs = jnp.exp(jnp.arange(half, dtype=f32) * -log_scale).reshape(1, half)
    row_idx = jax.lax.broadcasted_iota(jnp.int32, (r_blk, e_blk), 0)
    col_start = jax.lax.broadcasted_iota(jnp.int32, (r_blk, e_blk), 1) * n_actions
    expand = ((row_idx >= col_start)
              & (row_idx < col_start + n_actions)).astype(f32)   # (R_BLK, E_BLK)

    weights = [kp[k] for k in _WEIGHT_ORDER]

    flops = int(
        n_env_pad * (2 * 2 * half * (2 * time_dim)       # sin/cos matmuls
                     + 2 * (2 * time_dim) * time_dim     # second time linear
                     + 2 * time_dim * d_hidden           # t_embed @ W_t
                     + 2 * state_feat_dim * d_hidden)    # state   @ W_s
        + n_rows_pad * (2 * e_blk * d_hidden             # one-hot expansion
                        + 2 * action_dim * d_hidden
                        + 2 * d_hidden * d_hidden
                        + 2 * d_hidden * out_lanes))
    transcendentals = int(n_env_pad * (2 * half + 2 * time_dim)
                          + 2 * n_rows_pad * d_hidden)
    bytes_accessed = int(4 * (t2d.size + act_rows.size + state2d.size
                              + n_rows_pad * out_lanes
                              + freqs.size + expand.size
                              + sum(int(w.size) for w in weights)))

    in_specs = [
        # resident whole-array VMEM tables
        pl.BlockSpec(memory_space=pltpu.MemorySpace.VMEM),   # freqs
        pl.BlockSpec(memory_space=pltpu.MemorySpace.VMEM),   # expand
        # per-env-block inputs (all blocks sublane-dense: e_blk, r_blk % 8 == 0)
        pl.BlockSpec((e_blk, 1), lambda e: (e, 0)),
        pl.BlockSpec((r_blk, action_dim), lambda e: (e, 0)),
        pl.BlockSpec((e_blk, state_feat_dim), lambda e: (e, 0)),
    ] + [pl.BlockSpec(memory_space=pltpu.MemorySpace.VMEM) for _ in weights]

    out_rows = pl.pallas_call(
        _fused_policy_kernel,
        out_shape=jax.ShapeDtypeStruct((n_rows_pad, out_lanes), f32),
        grid_spec=pltpu.PrefetchScalarGridSpec(
            num_scalar_prefetch=0,
            grid=(n_blocks,),
            in_specs=in_specs,
            out_specs=pl.BlockSpec((r_blk, out_lanes), lambda e: (e, 0)),
        ),
        compiler_params=pltpu.CompilerParams(
            dimension_semantics=("parallel",)),
        cost_estimate=pl.CostEstimate(flops=flops,
                                      transcendentals=transcendentals,
                                      bytes_accessed=bytes_accessed),
    )(freqs, expand, t2d, act_rows, state2d, *weights)

    # Drop env padding and the lane padding of the final layer.
    out = out_rows.reshape(n_env_pad, n_actions, out_lanes)
    return out[:n_env, :, :action_dim]


# ----------------------------- pure-JAX reference ---------------------------


def reference_forward(params, action, time, state, time_dim=16):
    n_env, n_actions, action_dim = action.shape
    half = time_dim // 2
    scale = math.log(10000.0) / (half - 1)
    freqs = jnp.exp(jnp.arange(half, dtype=jnp.float32) * -scale)
    emb = time.astype(jnp.float32)[:, None] * freqs[None, :]
    emb = jnp.concatenate([jnp.sin(emb), jnp.cos(emb)], axis=-1)
    h = jnp.tanh(emb @ params["t_w1"] + params["t_b1"])
    t_embed = h @ params["t_w2"] + params["t_b2"]
    t_embed = jnp.broadcast_to(t_embed[:, None, :], (n_env, n_actions, time_dim))
    state_b = jnp.broadcast_to(state.astype(jnp.float32).reshape(n_env, 1, -1),
                               (n_env, n_actions, state.shape[-1]))
    x = jnp.concatenate([action.astype(jnp.float32), t_embed, state_b], axis=-1)
    h = jnp.tanh(x @ params["m_w1"] + params["m_b1"])
    h = jnp.tanh(h @ params["m_w2"] + params["m_b2"])
    return h @ params["f_w"] + params["f_b"]


# ----------------------------- main ------------------------------------------


if __name__ == "__main__":
    action_dim = 4
    state_feat_dim = 8
    time_dim = 16
    n_env = 2
    n_actions = 3

    key = jax.random.PRNGKey(0)
    k_param, k_act, k_time, k_state = jax.random.split(key, 4)

    params = init_params(k_param, action_dim, state_feat_dim, time_dim)
    kparams = prepare_kernel_params(params, action_dim, time_dim)

    action = jax.random.normal(k_act, (n_env, n_actions, action_dim), jnp.float32)
    time = jax.random.uniform(k_time, (n_env,), jnp.float32, 0.0, 10.0)
    state = jax.random.normal(k_state, (n_env, 1, state_feat_dim), jnp.float32)

    out = networks_forward(kparams, action, time, state, time_dim)
    out = jax.block_until_ready(out)

    ref = reference_forward(params, action, time, state, time_dim)
    assert out.shape == (n_env, n_actions, action_dim)
    assert jnp.allclose(out, ref, atol=1e-4, rtol=1e-4), (
        f"max abs diff {jnp.max(jnp.abs(out - ref))}")

    print("KERNEL_OK")
</pallas_src>

<mosaic_0001>
module attributes {stable_mosaic.version = 11 : i64} {
  func.func @_fused_policy_kernel(%arg0: i32, %arg1: memref<1x8xf32, #tpu.memory_space<vmem>>, %arg2: memref<24x8xf32, #tpu.memory_space<vmem>>, %arg3: memref<8x1xf32, #tpu.memory_space<vmem>>, %arg4: memref<24x4xf32, #tpu.memory_space<vmem>>, %arg5: memref<8x8xf32, #tpu.memory_space<vmem>>, %arg6: memref<8x32xf32, #tpu.memory_space<vmem>>, %arg7: memref<8x32xf32, #tpu.memory_space<vmem>>, %arg8: memref<1x32xf32, #tpu.memory_space<vmem>>, %arg9: memref<32x16xf32, #tpu.memory_space<vmem>>, %arg10: memref<1x16xf32, #tpu.memory_space<vmem>>, %arg11: memref<4x64xf32, #tpu.memory_space<vmem>>, %arg12: memref<16x64xf32, #tpu.memory_space<vmem>>, %arg13: memref<8x64xf32, #tpu.memory_space<vmem>>, %arg14: memref<1x64xf32, #tpu.memory_space<vmem>>, %arg15: memref<64x64xf32, #tpu.memory_space<vmem>>, %arg16: memref<1x64xf32, #tpu.memory_space<vmem>>, %arg17: memref<64x128xf32, #tpu.memory_space<vmem>>, %arg18: memref<1x128xf32, #tpu.memory_space<vmem>>, %arg19: memref<24x128xf32, #tpu.memory_space<vmem>>) attributes {dimension_semantics = [#tpu.dimension_semantics<parallel>], iteration_bounds = array<i64: 1>, scalar_prefetch = 0 : i64, scratch_operands = 0 : i64, tpu.core_type = #tpu.core_type<tc>, window_params = [{pipeline_mode = #tpu.pipeline_mode<synchronous>, transform_indices = @transform_0, window_bounds = array<i64: 1, 8>}, {pipeline_mode = #tpu.pipeline_mode<synchronous>, transform_indices = @transform_1, window_bounds = array<i64: 24, 8>}, {transform_indices = @transform_2, window_bounds = array<i64: 8, 1>}, {transform_indices = @transform_3, window_bounds = array<i64: 24, 4>}, {transform_indices = @transform_4, window_bounds = array<i64: 8, 8>}, {pipeline_mode = #tpu.pipeline_mode<synchronous>, transform_indices = @transform_5, window_bounds = array<i64: 8, 32>}, {pipeline_mode = #tpu.pipeline_mode<synchronous>, transform_indices = @transform_6, window_bounds = array<i64: 8, 32>}, {pipeline_mode = #tpu.pipeline_mode<synchronous>, transform_indices = @transform_7, window_bounds = array<i64: 1, 32>}, {pipeline_mode = #tpu.pipeline_mode<synchronous>, transform_indices = @transform_8, window_bounds = array<i64: 32, 16>}, {pipeline_mode = #tpu.pipeline_mode<synchronous>, transform_indices = @transform_9, window_bounds = array<i64: 1, 16>}, {pipeline_mode = #tpu.pipeline_mode<synchronous>, transform_indices = @transform_10, window_bounds = array<i64: 4, 64>}, {pipeline_mode = #tpu.pipeline_mode<synchronous>, transform_indices = @transform_11, window_bounds = array<i64: 16, 64>}, {pipeline_mode = #tpu.pipeline_mode<synchronous>, transform_indices = @transform_12, window_bounds = array<i64: 8, 64>}, {pipeline_mode = #tpu.pipeline_mode<synchronous>, transform_indices = @transform_13, window_bounds = array<i64: 1, 64>}, {pipeline_mode = #tpu.pipeline_mode<synchronous>, transform_indices = @transform_14, window_bounds = array<i64: 64, 64>}, {pipeline_mode = #tpu.pipeline_mode<synchronous>, transform_indices = @transform_15, window_bounds = array<i64: 1, 64>}, {pipeline_mode = #tpu.pipeline_mode<synchronous>, transform_indices = @transform_16, window_bounds = array<i64: 64, 128>}, {pipeline_mode = #tpu.pipeline_mode<synchronous>, transform_indices = @transform_17, window_bounds = array<i64: 1, 128>}, {transform_indices = @transform_18, window_bounds = array<i64: 24, 128>}]} {
    %c0 = arith.constant 0 : index
    %c0_0 = arith.constant 0 : index
    %0 = vector.load %arg3[%c0, %c0_0] : memref<8x1xf32, #tpu.memory_space<vmem>>, vector<8x1xf32>
    %c0_1 = arith.constant 0 : index
    %c0_2 = arith.constant 0 : index
    %1 = vector.load %arg1[%c0_1, %c0_2] : memref<1x8xf32, #tpu.memory_space<vmem>>, vector<1x8xf32>
    %2 = vector.broadcast %0 : vector<8x1xf32> to vector<8x8xf32>
    %3 = vector.broadcast %1 : vector<1x8xf32> to vector<8x8xf32>
    %4 = arith.mulf %2, %3 : vector<8x8xf32>
    %5 = math.sin %4 : vector<8x8xf32>
    %6 = math.cos %4 : vector<8x8xf32>
    %c0_3 = arith.constant 0 : index
    %c0_4 = arith.constant 0 : index
    %7 = vector.load %arg6[%c0_3, %c0_4] : memref<8x32xf32, #tpu.memory_space<vmem>>, vector<8x32xf32>
    %cst = arith.constant dense<0.000000e+00> : vector<8x32xf32>
    %8 = tpu.matmul %5, %7, %cst {dimension_numbers = #tpu.dot_dimension_numbers<[1], [0], [0], [1], [0, 0, 1, 1], [], []>} : vector<8x8xf32>, vector<8x32xf32>, vector<8x32xf32> -> vector<8x32xf32>
    %c0_5 = arith.constant 0 : index
    %c0_6 = arith.constant 0 : index
    %9 = vector.load %arg7[%c0_5, %c0_6] : memref<8x32xf32, #tpu.memory_space<vmem>>, vector<8x32xf32>
    %cst_7 = arith.constant dense<0.000000e+00> : vector<8x32xf32>
    %10 = tpu.matmul %6, %9, %cst_7 {dimension_numbers = #tpu.dot_dimension_numbers<[1], [0], [0], [1], [0, 0, 1, 1], [], []>} : vector<8x8xf32>, vector<8x32xf32>, vector<8x32xf32> -> vector<8x32xf32>
    %11 = arith.addf %8, %10 : vector<8x32xf32>
    %c0_8 = arith.constant 0 : index
    %c0_9 = arith.constant 0 : index
    %12 = vector.load %arg8[%c0_8, %c0_9] : memref<1x32xf32, #tpu.memory_space<vmem>>, vector<1x32xf32>
    %13 = vector.broadcast %12 : vector<1x32xf32> to vector<8x32xf32>
    %14 = arith.addf %11, %13 : vector<8x32xf32>
    %15 = math.tanh %14 : vector<8x32xf32>
    %c0_10 = arith.constant 0 : index
    %c0_11 = arith.constant 0 : index
    %16 = vector.load %arg9[%c0_10, %c0_11] : memref<32x16xf32, #tpu.memory_space<vmem>>, vector<32x16xf32>
    %cst_12 = arith.constant dense<0.000000e+00> : vector<8x16xf32>
    %17 = tpu.matmul %15, %16, %cst_12 {dimension_numbers = #tpu.dot_dimension_numbers<[1], [0], [0], [1], [0, 0, 1, 1], [], []>} : vector<8x32xf32>, vector<32x16xf32>, vector<8x16xf32> -> vector<8x16xf32>
    %c0_13 = arith.constant 0 : index
    %c0_14 = arith.constant 0 : index
    %18 = vector.load %arg10[%c0_13, %c0_14] : memref<1x16xf32, #tpu.memory_space<vmem>>, vector<1x16xf32>
    %19 = vector.broadcast %18 : vector<1x16xf32> to vector<8x16xf32>
    %20 = arith.addf %17, %19 : vector<8x16xf32>
    %c0_15 = arith.constant 0 : index
    %c0_16 = arith.constant 0 : index
    %21 = vector.load %arg12[%c0_15, %c0_16] : memref<16x64xf32, #tpu.memory_space<vmem>>, vector<16x64xf32>
    %cst_17 = arith.constant dense<0.000000e+00> : vector<8x64xf32>
    %22 = tpu.matmul %20, %21, %cst_17 {dimension_numbers = #tpu.dot_dimension_numbers<[1], [0], [0], [1], [0, 0, 1, 1], [], []>} : vector<8x16xf32>, vector<16x64xf32>, vector<8x64xf32> -> vector<8x64xf32>
    %c0_18 = arith.constant 0 : index
    %c0_19 = arith.constant 0 : index
    %23 = vector.load %arg5[%c0_18, %c0_19] : memref<8x8xf32, #tpu.memory_space<vmem>>, vector<8x8xf32>
    %c0_20 = arith.constant 0 : index
    %c0_21 = arith.constant 0 : index
    %24 = vector.load %arg13[%c0_20, %c0_21] : memref<8x64xf32, #tpu.memory_space<vmem>>, vector<8x64xf32>
    %cst_22 = arith.constant dense<0.000000e+00> : vector<8x64xf32>
    %25 = tpu.matmul %23, %24, %cst_22 {dimension_numbers = #tpu.dot_dimension_numbers<[1], [0], [0], [1], [0, 0, 1, 1], [], []>} : vector<8x8xf32>, vector<8x64xf32>, vector<8x64xf32> -> vector<8x64xf32>
    %26 = arith.addf %22, %25 : vector<8x64xf32>
    %c0_23 = arith.constant 0 : index
    %c0_24 = arith.constant 0 : index
    %27 = vector.load %arg14[%c0_23, %c0_24] : memref<1x64xf32, #tpu.memory_space<vmem>>, vector<1x64xf32>
    %28 = vector.broadcast %27 : vector<1x64xf32> to vector<8x64xf32>
    %29 = arith.addf %26, %28 : vector<8x64xf32>
    %c0_25 = arith.constant 0 : index
    %c0_26 = arith.constant 0 : index
    %30 = vector.load %arg2[%c0_25, %c0_26] : memref<24x8xf32, #tpu.memory_space<vmem>>, vector<24x8xf32>
    %cst_27 = arith.constant dense<0.000000e+00> : vector<24x64xf32>
    %31 = tpu.matmul %30, %29, %cst_27 {dimension_numbers = #tpu.dot_dimension_numbers<[1], [0], [0], [1], [0, 0, 1, 1], [], []>} : vector<24x8xf32>, vector<8x64xf32>, vector<24x64xf32> -> vector<24x64xf32>
    %c0_28 = arith.constant 0 : index
    %c0_29 = arith.constant 0 : index
    %32 = vector.load %arg4[%c0_28, %c0_29] : memref<24x4xf32, #tpu.memory_space<vmem>>, vector<24x4xf32>
    %c0_30 = arith.constant 0 : index
    %c0_31 = arith.constant 0 : index
    %33 = vector.load %arg11[%c0_30, %c0_31] : memref<4x64xf32, #tpu.memory_space<vmem>>, vector<4x64xf32>
    %cst_32 = arith.constant dense<0.000000e+00> : vector<24x64xf32>
    %34 = tpu.matmul %32, %33, %cst_32 {dimension_numbers = #tpu.dot_dimension_numbers<[1], [0], [0], [1], [0, 0, 1, 1], [], []>} : vector<24x4xf32>, vector<4x64xf32>, vector<24x64xf32> -> vector<24x64xf32>
    %35 = arith.addf %34, %31 : vector<24x64xf32>
    %36 = math.tanh %35 : vector<24x64xf32>
    %c0_33 = arith.constant 0 : index
    %c0_34 = arith.constant 0 : index
    %37 = vector.load %arg15[%c0_33, %c0_34] : memref<64x64xf32, #tpu.memory_space<vmem>>, vector<64x64xf32>
    %cst_35 = arith.constant dense<0.000000e+00> : vector<24x64xf32>
    %38 = tpu.matmul %36, %37, %cst_35 {dimension_numbers = #tpu.dot_dimension_numbers<[1], [0], [0], [1], [0, 0, 1, 1], [], []>} : vector<24x64xf32>, vector<64x64xf32>, vector<24x64xf32> -> vector<24x64xf32>
    %c0_36 = arith.constant 0 : index
    %c0_37 = arith.constant 0 : index
    %39 = vector.load %arg16[%c0_36, %c0_37] : memref<1x64xf32, #tpu.memory_space<vmem>>, vector<1x64xf32>
    %40 = vector.broadcast %39 : vector<1x64xf32> to vector<24x64xf32>
    %41 = arith.addf %38, %40 : vector<24x64xf32>
    %42 = math.tanh %41 : vector<24x64xf32>
    %c0_38 = arith.constant 0 : index
    %c0_39 = arith.constant 0 : index
    %43 = vector.load %arg17[%c0_38, %c0_39] : memref<64x128xf32, #tpu.memory_space<vmem>>, vector<64x128xf32>
    %cst_40 = arith.constant dense<0.000000e+00> : vector<24x128xf32>
    %44 = tpu.matmul %42, %43, %cst_40 {dimension_numbers = #tpu.dot_dimension_numbers<[1], [0], [0], [1], [0, 0, 1, 1], [], []>} : vector<24x64xf32>, vector<64x128xf32>, vector<24x128xf32> -> vector<24x128xf32>
    %c0_41 = arith.constant 0 : index
    %c0_42 = arith.constant 0 : index
    %45 = vector.load %arg18[%c0_41, %c0_42] : memref<1x128xf32, #tpu.memory_space<vmem>>, vector<1x128xf32>
    %46 = vector.broadcast %45 : vector<1x128xf32> to vector<24x128xf32>
    %47 = arith.addf %44, %46 : vector<24x128xf32>
    %c0_43 = arith.constant 0 : index
    %c0_44 = arith.constant 0 : index
    %48 = vector.load %arg19[%c0_43, %c0_44] : memref<24x128xf32, #tpu.memory_space<vmem>>, vector<24x128xf32>
    tpu.vector_store %arg19[%c0_43, %c0_44], %47 {strides = array<i32>} : memref<24x128xf32, #tpu.memory_space<vmem>>, vector<24x128xf32>,
    return
  }
  func.func @transform_0(%arg0: i32) -> (i32, i32) {
    %c0_i32 = arith.constant 0 : i32
    %c0_i32_0 = arith.constant 0 : i32
    %c0_i32_1 = arith.constant 0 : i32
    return %c0_i32, %c0_i32_0 : i32, i32
  }
  func.func @transform_1(%arg0: i32) -> (i32, i32) {
    %c0_i32 = arith.constant 0 : i32
    %c0_i32_0 = arith.constant 0 : i32
    %c0_i32_1 = arith.constant 0 : i32
    return %c0_i32, %c0_i32_0 : i32, i32
  }
  func.func @transform_2(%arg0: i32) -> (i32, i32) {
    %c0_i32 = arith.constant 0 : i32
    %c0_i32_0 = arith.constant 0 : i32
    return %arg0, %c0_i32 : i32, i32
  }
  func.func @transform_3(%arg0: i32) -> (i32, i32) {
    %c0_i32 = arith.constant 0 : i32
    %c0_i32_0 = arith.constant 0 : i32
    return %arg0, %c0_i32 : i32, i32
  }
  func.func @transform_4(%arg0: i32) -> (i32, i32) {
    %c0_i32 = arith.constant 0 : i32
    %c0_i32_0 = arith.constant 0 : i32
    return %arg0, %c0_i32 : i32, i32
  }
  func.func @transform_5(%arg0: i32) -> (i32, i32) {
    %c0_i32 = arith.constant 0 : i32
    %c0_i32_0 = arith.constant 0 : i32
    %c0_i32_1 = arith.constant 0 : i32
    return %c0_i32, %c0_i32_0 : i32, i32
  }
  func.func @transform_6(%arg0: i32) -> (i32, i32) {
    %c0_i32 = arith.constant 0 : i32
    %c0_i32_0 = arith.constant 0 : i32
    %c0_i32_1 = arith.constant 0 : i32
    return %c0_i32, %c0_i32_0 : i32, i32
  }
  func.func @transform_7(%arg0: i32) -> (i32, i32) {
    %c0_i32 = arith.constant 0 : i32
    %c0_i32_0 = arith.constant 0 : i32
    %c0_i32_1 = arith.constant 0 : i32
    return %c0_i32, %c0_i32_0 : i32, i32
  }
  func.func @transform_8(%arg0: i32) -> (i32, i32) {
    %c0_i32 = arith.constant 0 : i32
    %c0_i32_0 = arith.constant 0 : i32
    %c0_i32_1 = arith.constant 0 : i32
    return %c0_i32, %c0_i32_0 : i32, i32
  }
  func.func @transform_9(%arg0: i32) -> (i32, i32) {
    %c0_i32 = arith.constant 0 : i32
    %c0_i32_0 = arith.constant 0 : i32
    %c0_i32_1 = arith.constant 0 : i32
    return %c0_i32, %c0_i32_0 : i32, i32
  }
  func.func @transform_10(%arg0: i32) -> (i32, i32) {
    %c0_i32 = arith.constant 0 : i32
    %c0_i32_0 = arith.constant 0 : i32
    %c0_i32_1 = arith.constant 0 : i32
    return %c0_i32, %c0_i32_0 : i32, i32
  }
  func.func @transform_11(%arg0: i32) -> (i32, i32) {
    %c0_i32 = arith.constant 0 : i32
    %c0_i32_0 = arith.constant 0 : i32
    %c0_i32_1 = arith.constant 0 : i32
    return %c0_i32, %c0_i32_0 : i32, i32
  }
  func.func @transform_12(%arg0: i32) -> (i32, i32) {
    %c0_i32 = arith.constant 0 : i32
    %c0_i32_0 = arith.constant 0 : i32
    %c0_i32_1 = arith.constant 0 : i32
    return %c0_i32, %c0_i32_0 : i32, i32
  }
  func.func @transform_13(%arg0: i32) -> (i32, i32) {
    %c0_i32 = arith.constant 0 : i32
    %c0_i32_0 = arith.constant 0 : i32
    %c0_i32_1 = arith.constant 0 : i32
    return %c0_i32, %c0_i32_0 : i32, i32
  }
  func.func @transform_14(%arg0: i32) -> (i32, i32) {
    %c0_i32 = arith.constant 0 : i32
    %c0_i32_0 = arith.constant 0 : i32
    %c0_i32_1 = arith.constant 0 : i32
    return %c0_i32, %c0_i32_0 : i32, i32
  }
  func.func @transform_15(%arg0: i32) -> (i32, i32) {
    %c0_i32 = arith.constant 0 : i32
    %c0_i32_0 = arith.constant 0 : i32
    %c0_i32_1 = arith.constant 0 : i32
    return %c0_i32, %c0_i32_0 : i32, i32
  }
  func.func @transform_16(%arg0: i32) -> (i32, i32) {
    %c0_i32 = arith.constant 0 : i32
    %c0_i32_0 = arith.constant 0 : i32
    %c0_i32_1 = arith.constant 0 : i32
    return %c0_i32, %c0_i32_0 : i32, i32
  }
  func.func @transform_17(%arg0: i32) -> (i32, i32) {
    %c0_i32 = arith.constant 0 : i32
    %c0_i32_0 = arith.constant 0 : i32
    %c0_i32_1 = arith.constant 0 : i32
    return %c0_i32, %c0_i32_0 : i32, i32
  }
  func.func @transform_18(%arg0: i32) -> (i32, i32) {
    %c0_i32 = arith.constant 0 : i32
    %c0_i32_0 = arith.constant 0 : i32
    return %arg0, %c0_i32 : i32, i32
  }
}

</mosaic_0001>

<bundles_post_ra>
// kernel: tpu_custom_call.1
= control target key start
LH: loop header
LB: loop body
LE: loop exit
PB: predicated region body
PF: predicated region fallthrough
CT: control target
= control target key end

     0   :  { %s1518_s0 = inlined_call_operand.hbm [shape: f32[1,8], index: 0, kind: input, shape index: {}]   ;;  %s1519_s1 = inlined_call_operand.vmem [shape: f32[24,8], index: 1, kind: input, shape index: {}]   ;;  %s1520_s2 = inlined_call_operand.vmem [shape: f32[8,1], index: 2, kind: input, shape index: {}]   ;;  %s1521_s3 = inlined_call_operand.vmem [shape: f32[24,4], index: 3, kind: input, shape index: {}]   ;;  %s1522_s4 = inlined_call_operand.hbm [shape: f32[8,8], index: 4, kind: input, shape index: {}]   ;;  %s1523_s5 = inlined_call_operand.hbm [shape: f32[8,32], index: 5, kind: input, shape index: {}]   ;;  %s1524_s6 = inlined_call_operand.hbm [shape: f32[8,32], index: 6, kind: input, shape index: {}]   ;;  %s1525_s7 = inlined_call_operand.hbm [shape: f32[1,32], index: 7, kind: input, shape index: {}]   ;;  %s1526_s8 = inlined_call_operand.vmem [shape: f32[32,16], index: 8, kind: input, shape index: {}]   ;;  %s1527_s9 = inlined_call_operand.hbm [shape: f32[1,16], index: 9, kind: input, shape index: {}]   ;;  %s1528_s10 = inlined_call_operand.hbm [shape: f32[4,64], index: 10, kind: input, shape index: {}]   ;;  %s1529_s11 = inlined_call_operand.hbm [shape: f32[16,64], index: 11, kind: input, shape index: {}]   ;;  %s1530_s12 = inlined_call_operand.hbm [shape: f32[8,64], index: 12, kind: input, shape index: {}]   ;;  %s1531_s13 = inlined_call_operand.hbm [shape: f32[1,64], index: 13, kind: input, shape index: {}]   ;;  %s1532_s14 = inlined_call_operand.vmem [shape: f32[64,64], index: 14, kind: input, shape index: {}]   ;;  %s1533_s15 = inlined_call_operand.vmem [shape: f32[1,64], index: 15, kind: input, shape index: {}]   ;;  %s1534_s16 = inlined_call_operand.vmem [shape: f32[64,128], index: 16, kind: input, shape index: {}]   ;;  %s1535_s17 = inlined_call_operand.vmem [shape: f32[1,128], index: 17, kind: input, shape index: {}]   ;;  %s1536_s18 = inlined_call_operand.hbm [shape: f32[24,128], index: 18, kind: output, shape index: {}]  }
   0x1   :  { %1538 = sst [smem:[#allocation27_spill]] %s1518_s0 }
   0x2   :  { %1539 = sst [smem:[#allocation28_spill]] %s1519_s1 }
   0x3   :  { %1540 = sst [smem:[#allocation29_spill]] %s1520_s2 }
   0x4   :  { %23 = vsyncpa [#allocation3], 0 }
   0x5   :  { %24 = vsyncpa [#allocation6], 0 }
   0x6   :  { %25 = vsyncpa [#allocation9], 0 }
   0x7   :  { %26 = vsyncpa [#allocation12], 0 }
   0x8   :  { %27 = vsyncpa [#allocation15], 0 }
   0x9   :  { %28 = vsyncpa [#allocation18], 0  ;;  %s52_s29 = sshll.u32 %s1522_s4, 4  ;;  %s53_s29 = int_to_ptr.hbm [resolvable:$true] %s52_s29 }
   0xa   :  { %29 = vsyncpa [#allocation4], 0  ;;  %s1214_s30 = smov [#allocation5]   ;;  %s74_s20 = sshll.u32 %s1524_s6, 4  ;;  %s75_s20 = int_to_ptr.hbm [resolvable:$true] %s74_s20 }
   0xb   :  { %s54_s0 = sshll.u32 %s1214_s30, 4  ;;  %s1215_s21 = smov [#allocation8]   ;;  %s55_s0 = int_to_ptr.vmem [resolvable:$true] %s54_s0 }
   0xc   :  { %57 = dma.hbm_to_vmem [thread:$0]  %s53_s29, 128, %s55_s0, [#allocation6]  }
   0xd   :  { %s76_s22 = sshll.u32 %s1215_s21, 4  ;;  %s98_s24 = sshll.u32 %s1527_s9, 4  ;;  %s77_s22 = int_to_ptr.vmem [resolvable:$true] %s76_s22  ;;  %s99_s24 = int_to_ptr.hbm [resolvable:$true] %s98_s24 }
   0xe   :  { %79 = dma.hbm_to_vmem [thread:$0]  %s75_s20, 128, %s77_s22, [#allocation9]  }
   0xf   :  { %s119_s26 = sshll.u32 %s1529_s11, 4  ;;  %s1216_s27 = smov [#allocation11]   ;;  %s120_s26 = int_to_ptr.hbm [resolvable:$true] %s119_s26 }
  0x10   :  { %s100_s28 = sshll.u32 %s1216_s27, 4  ;;  %s1217_s6 = smov [#allocation14]   ;;  %s101_s28 = int_to_ptr.vmem [resolvable:$true] %s100_s28 }
  0x11   :  { %103 = dma.hbm_to_vmem [thread:$0]  %s99_s24, 16, %s101_s28, [#allocation12]  }
  0x12   :  { %s121_s29 = sshll.u32 %s1217_s6, 4  ;;  %s1218_s30 = smov 128   ;;  %s122_s29 = int_to_ptr.vmem [resolvable:$true] %s121_s29 }
  0x13   :  { %s1219_s0 = smov 8   ;;  %s1541_s1 = sld [smem:[#allocation27_spill]] }
  0x14   :  { %127 = dma.hbm_to_vmem [thread:$0]  %s120_s26, 256, %s122_s29, [#allocation15], %s1218_s30, %s1218_s30, %s1219_s0  }
  0x15   :  { %s1220_s11 = smov [#allocation2]   ;;  %s63_s23 = sshll.u32 %s1523_s5, 4  ;;  %s64_s23 = int_to_ptr.hbm [resolvable:$true] %s63_s23 }
  0x16   :  { %s37_s21 = sshll.u32 %s1220_s11, 4  ;;  %s1221_s24 = smov [#allocation7]   ;;  %s38_s21 = int_to_ptr.vmem [resolvable:$true] %s37_s21 }
  0x17   :  { %s65_s4 = sshll.u32 %s1221_s24, 4  ;;  %s85_s26 = sshll.u32 %s1525_s7, 4  ;;  %s66_s4 = int_to_ptr.vmem [resolvable:$true] %s65_s4  ;;  %s86_s26 = int_to_ptr.hbm [resolvable:$true] %s85_s26 }
  0x18   :  { %68 = dma.hbm_to_vmem [thread:$0]  %s64_s23, 128, %s66_s4, [#allocation6]  }
  0x19   :  { %s35_s20 = sshll.u32 %s1541_s1, 4  ;;  %s109_s29 = sshll.u32 %s1528_s10, 4  ;;  %s36_s20 = int_to_ptr.hbm [resolvable:$true] %s35_s20  ;;  %s110_s29 = int_to_ptr.hbm [resolvable:$true] %s109_s29 }
  0x1a   :  { %40 = dma.hbm_to_vmem [thread:$0]  %s36_s20, 16, %s38_s21, [#allocation3]  }
  0x1b   :  { %s1222_s9 = smov [#allocation10]   ;;  %s1223_s5 = smov [#allocation13]  }
  0x1c   :  { %s87_s19 = sshll.u32 %s1222_s9, 4  ;;  %s111_s1 = sshll.u32 %s1223_s5, 4  ;;  %s88_s19 = int_to_ptr.vmem [resolvable:$true] %s87_s19  ;;  %s112_s1 = int_to_ptr.vmem [resolvable:$true] %s111_s1 }
  0x1d   :  { %90 = dma.hbm_to_vmem [thread:$0]  %s86_s26, 16, %s88_s19, [#allocation9]  }
  0x1e   :  { %s133_s21 = sshll.u32 %s1530_s12, 4  ;;  %s144_s2 = sshll.u32 %s1531_s13, 4  ;;  %s134_s21 = int_to_ptr.hbm [resolvable:$true] %s133_s21  ;;  %s145_s2 = int_to_ptr.hbm [resolvable:$true] %s144_s2 }
  0x1f   :  { %114 = dma.hbm_to_vmem [thread:$0]  %s110_s29, 64, %s112_s1, [#allocation12]  }
  0x20   :  { %s1224_s23 = smov [#allocation16]   ;;  %s1225_s24 = smov [#allocation17]  }
  0x21   :  { %s135_s10 = sshll.u32 %s1224_s23, 4  ;;  %s146_s4 = sshll.u32 %s1225_s24, 4  ;;  %s136_s10 = int_to_ptr.vmem [resolvable:$true] %s135_s10  ;;  %s147_s4 = int_to_ptr.vmem [resolvable:$true] %s146_s4 }
  0x22   :  { %138 = dma.hbm_to_vmem [thread:$0]  %s134_s21, 128, %s136_s10, [#allocation15]  }
  0x23   :  { %149 = dma.hbm_to_vmem [thread:$0]  %s145_s2, 16, %s147_s4, [#allocation18]  }
  0x24   :  { %1200 = dma.done.wait [#allocation3], 16  }
  0x25   :  { %1201 = vsyncadd [#allocation3], 4294967280 }
  0x26   :  { %1202 = dma.done.wait [#allocation6], 256  }
  0x27   :  { %1203 = vsyncadd [#allocation6], 4294967040 }
  0x28   :  { %1204 = dma.done.wait [#allocation9], 144  }
  0x29   :  { %1205 = vsyncadd [#allocation9], 4294967152 }
  0x2a   :  { %1206 = dma.done.wait [#allocation12], 80  }
  0x2b   :  { %1207 = vsyncadd [#allocation12], 4294967216 }
  0x2c   :  { %1208 = dma.done.wait [#allocation15], 384  }
  0x2d   :  { %1209 = vsyncadd [#allocation15], 4294966912 }
  0x2e   :  { %1210 = dma.done.wait [#allocation18], 16  }
  0x2f   :  { %1211 = vsyncadd [#allocation18], 4294967280  ;;  %v1226_v0 = vmov 0   ;;  %s1542_s25 = sld [smem:[#allocation29_spill]]  ;;  %v519_v2 = vld [vmem:[#allocation8] sm:$0xff]  ;;  %v518_v3 = vld [vmem:[#allocation7] sm:$0xff] }
  0x30   :  { %915 = vset.pattern.permute.xlu0 %v1226_v0  ;;  %539 = vmatpush.msra.mxu0 %v519_v2  ;;  %v916_v4 = vld [vmem:[#allocation2] ss:$0 sm:$0xff]  ;;  %v1227_v18 = vmov 683565275   ;;  %v1228_v20 = vmov 2475754826  }
  0x31   :  { %562 = vmatpush.msra.mxu1 %v518_v3  ;;  %v1229_v22 = vmov 2131351028   ;;  %v1230_v24 = vmov 2102212464   ;;  %v1231_v29 = vmov 920167782  }
  0x32   :  { %v1232_v32 = vmov 1326507024   ;;  %s1543_s13 = sld [smem:[#allocation28_spill]]  ;;  %s1233_s19 = smov [#allocation19]  }
  0x33   :  { %s851_s5 = sshll.u32 %s1233_s19, 4  ;;  %s853_s20 = sshll.u32 %s1536_s18, 4  ;;  %s852_s5 = int_to_ptr.vmem [resolvable:$true] %s851_s5  ;;  %s854_s20 = int_to_ptr.hbm [resolvable:$true] %s853_s20 }
  0x35   :  { %v198_v1 = vld [vmem:[%s1542_s25] sm:$0xff] }
  0x36   :  { %202 = vperm.xlu0 %915, %v198_v1  }
  0xa8   :  { %v203_v5 = vpop.permute.xlu0 %202 }
  0xa9   :  { %v1366_v6 = vmul.f32 %v916_v4, %v203_v5 }
  0xab   :  { %v212_v7 = vand.u32 2139095040, %v1366_v6  ;;  %v209_v9 = vand.u32 2147483647, %v1366_v6  ;;  %vm211_vm12 = vcmp.lt.s32.totalorder %v1366_v6, 0 }
  0xad   :  { %v213_v8 = vshrl.u32 %v212_v7, 23  ;;  %v216_v12 = vand.u32 8388607, %v209_v9  ;;  %vm210_vm13 = vcmp.le.f32.partialorder %v209_v9, 0.7853982 }
  0xaf   :  { %v871_v10 = vadd.s32 4294967169, %v213_v8  ;;  %v217_v15 = vor.u32 8388608, %v216_v12 }
  0xb1   :  { %v219_v11 = vadd.s32 1, %v871_v10  ;;  %v1374_v34 = vshll.u32 %v217_v15, 8 }
  0xb3   :  { %vm220_vm0 = vcmp.gt.s32.totalorder %v219_v11, 0  ;;  %v258_v46 = vand.u32 65535, %v1374_v34  ;;  %v259_v48 = vshrl.u32 %v1374_v34, 16 }
  0xb4   :  { %v221_v13 = vsel %vm220_vm0, %v219_v11, 0 }
  0xb5   :  { %v223_v14 = vand.u32 31, %v221_v13  ;;  %v1372_v16 = vshrl.u32 %v221_v13, 5 }
  0xb7   :  { %v224_v17 = vsub.s32 32, %v223_v14  ;;  %v226_v19 = vshll.u32 %v1227_v18, %v223_v14  ;;  %v229_v21 = vshll.u32 %v1228_v20, %v223_v14  ;;  %v232_v23 = vshll.u32 %v1229_v22, %v223_v14 }
  0xb8   :  { %v235_v25 = vshll.u32 %v1230_v24, %v223_v14  ;;  %v238_v31 = vshll.u32 %v1231_v29, %v223_v14  ;;  %vm241_vm1 = vcmp.lt.s32.totalorder %v1372_v16, 1  ;;  %vm244_vm2 = vcmp.lt.s32.totalorder %v1372_v16, 4 }
  0xb9   :  { %v227_v26 = vshrl.u32 %v1228_v20, %v224_v17  ;;  %v230_v27 = vshrl.u32 %v1229_v22, %v224_v17  ;;  %v233_v28 = vshrl.u32 %v1230_v24, %v224_v17  ;;  %v236_v30 = vshrl.u32 %v1231_v29, %v224_v17 }
  0xba   :  { %v239_v33 = vshrl.u32 %v1232_v32, %v224_v17  ;;  %vm243_vm3 = vcmp.lt.s32.totalorder %v1372_v16, 3  ;;  %vm242_vm4 = vcmp.lt.s32.totalorder %v1372_v16, 2  ;;  %v225_v11 = vshrl.u32 %v1227_v18, %v224_v17 }
  0xbb   :  { %v228_v35 = vor.u32 %v227_v26, %v226_v19  ;;  %v231_v36 = vor.u32 %v230_v27, %v229_v21  ;;  %v234_v37 = vor.u32 %v233_v28, %v232_v23  ;;  %v237_v38 = vor.u32 %v236_v30, %v235_v25 }
  0xbc   :  { %v240_v39 = vor.u32 %v239_v33, %v238_v31 }
  0xbd   :  { %v249_v40 = vsel %vm241_vm1, %v228_v35, %v231_v36  ;;  %v250_v41 = vsel %vm244_vm2, %v237_v38, 920167782  ;;  %v253_v42 = vsel %vm241_vm1, %v231_v36, %v234_v37  ;;  %v246_v7 = vsel %vm244_vm2, %v234_v37, 2102212464 }
  0xbe   :  { %v251_v43 = vsel %vm243_vm3, %v234_v37, %v250_v41  ;;  %v254_v44 = vsel %vm244_vm2, %v240_v39, 1326507024  ;;  %v245_v20 = vsel %vm241_vm1, %v225_v11, %v228_v35  ;;  %v247_v21 = vsel %vm243_vm3, %v231_v36, %v246_v7 }
  0xbf   :  { %v255_v45 = vsel %vm243_vm3, %v237_v38, %v254_v44  ;;  %v252_v47 = vsel %vm242_vm4, %v249_v40, %v251_v43  ;;  %v248_v18 = vsel %vm242_vm4, %v245_v20, %v247_v21  ;;  %vm520_vm1 = vcmask 64512  }
  0xc0   :  { %v256_v49 = vsel %vm242_vm4, %v253_v42, %v255_v45  ;;  %v282_v50 = vand.u32 65535, %v252_v47  ;;  %v283_v51 = vshrl.u32 %v252_v47, 16  ;;  %v302_v30 = vmul.u32 %v1374_v34, %v248_v18  ;;  %v575_v18 = vld [vmem:[%s1526_s8 + $0x10] sm:$0xff] }
  0xc1   :  { %v260_v52 = vand.u32 65535, %v256_v49  ;;  %v261_v53 = vshrl.u32 %v256_v49, 16 }
  0xc2   :  { %v285_v54 = vmul.u32 %v283_v51, %v258_v46  ;;  %v286_v55 = vmul.u32 %v282_v50, %v259_v48  ;;  %v284_v58 = vmul.u32 %v282_v50, %v258_v46  ;;  %v287_v62 = vmul.u32 %v283_v51, %v259_v48 }
  0xc3   :  { %v263_v56 = vmul.u32 %v261_v53, %v258_v46  ;;  %v264_v57 = vmul.u32 %v260_v52, %v259_v48  ;;  %v262_v60 = vmul.u32 %v260_v52, %v258_v46  ;;  %v265_v63 = vmul.u32 %v261_v53, %v259_v48 }
  0xc4   :  { %v288_v59 = vshll.u32 %v285_v54, 16  ;;  %v290_v1 = vshll.u32 %v286_v55, 16  ;;  %v289_v15 = vshrl.u32 %v285_v54, 16  ;;  %v291_v24 = vshrl.u32 %v286_v55, 16 }
  0xc5   :  { %v266_v61 = vshll.u32 %v263_v56, 16  ;;  %v268_v3 = vshll.u32 %v264_v57, 16  ;;  %v267_v22 = vshrl.u32 %v263_v56, 16  ;;  %v269_v26 = vshrl.u32 %v264_v57, 16 }
  0xc6   :  { %vm292_vm5 = vc.u32 %v284_v58, %v288_v59  ;;  %v294_v2 = vadd.s32 %v288_v59, %v284_v58 }
  0xc7   :  { %vm270_vm6 = vc.u32 %v262_v60, %v266_v61  ;;  %v272_v4 = vadd.s32 %v266_v61, %v262_v60  ;;  %v293_v5 = vsel %vm292_vm5, 1, %v1226_v0  ;;  %vm352_vm5 = vweird.f32 %v1366_v6 }
  0xc8   :  { %v271_v8 = vsel %vm270_vm6, 1, %v1226_v0  ;;  %v295_v10 = vadd.s32 %v293_v5, %v287_v62  ;;  %vm296_vm7 = vc.u32 %v294_v2, %v290_v1  ;;  %vm581_vm6 = vcmask 261120  }
  0xc9   :  { %v273_v12 = vadd.s32 %v271_v8, %v265_v63  ;;  %vm274_vm8 = vc.u32 %v272_v4, %v268_v3  ;;  %v297_v13 = vsel %vm296_vm7, 1, %v1226_v0  ;;  %vm713_vm7 = vcmask 1043456  }
  0xca   :  { %v275_v14 = vsel %vm274_vm8, 1, %v1226_v0  ;;  %v299_v19 = vadd.s32 %v297_v13, %v295_v10  ;;  %v298_v0 = vadd.s32 %v294_v2, %v290_v1  ;;  %vm632_vm8 = vcmask 130048  }
  0xcb   :  { %v277_v23 = vadd.s32 %v275_v14, %v273_v12 }
  0xcc   :  { %v300_v25 = vadd.s32 %v299_v19, %v289_v15 }
  0xcd   :  { %v278_v17 = vadd.s32 %v277_v23, %v267_v22 }
  0xce   :  { %v301_v27 = vadd.s32 %v300_v25, %v291_v24 }
  0xcf   :  { %v279_v28 = vadd.s32 %v278_v17, %v269_v26  ;;  %v576_v17 = vld [vmem:[%s1526_s8 + $0x18] sm:$0xff] }
  0xd0   :  { %v305_v29 = vadd.s32 1, %v301_v27  ;;  %597 = vmatpush.msra.mxu2 %v576_v17 }
  0xd1   :  { %vm304_vm9 = vc.u32 %v279_v28, %v298_v0  ;;  %v303_v42 = vadd.s32 %v298_v0, %v279_v28  ;;  %v608_v28 = vld [vmem:[#allocation16] sm:$0xff]  ;;  %v607_v0 = vld [vmem:[#allocation5] sm:$0xff] }
  0xd2   :  { %v306_v31 = vsel %vm304_vm9, %v305_v29, %v301_v27  ;;  %598 = vmatpush.msra.mxu2 %v575_v18  ;;  %v573_v27 = vld [vmem:[%s1526_s8] sm:$0xff]  ;;  %627 = vmatpush.msra.mxu3 %v608_v28  ;;  %v917_v29 = vld [vmem:[#allocation10] ss:$0 sm:$0xff]  ;;  %vm703_vm9 = vcmask 31744  }
  0xd3   :  { %v307_v32 = vadd.s32 %v306_v31, %v302_v30  ;;  %880 = vmatmul.msk.f32.vlgmr.msra.gmra.mxu3 %vm520_vm1, %v607_v0 }
  0xd5   :  { %v308_v33 = vadd.s32 536870912, %v307_v32 }
  0xd7   :  { %v309_v35 = vshrl.u32 %v308_v33, 30 }
  0xd9   :  { %v310_v36 = vshll.u32 %v309_v35, 30  ;;  %v333_v55 = vsub.s32 4, %v309_v35 }
  0xdb   :  { %v311_v37 = vsub.s32 %v307_v32, %v310_v36  ;;  %v334_v60 = vsel %vm211_vm12, %v333_v55, %v309_v35  ;;  %v606_v36 = vld [vmem:[#allocation14 + $0x8] sm:$0xff]  ;;  %v749_v55 = vld [vmem:[%s1532_s14 + $0x18] sm:$0xff] }
  0xdc   :  { %v336_v63 = vsel %vm210_vm13, 0, %v334_v60  ;;  %650 = vmatpush.msrb.mxu1 %v606_v36  ;;  %v804_v60 = vld [vmem:[%s1534_s16 + $0x38] sm:$0xff] }
  0xdd   :  { %vm312_vm10 = vcmp.lt.s32.totalorder %v311_v37, 0  ;;  %v313_v38 = vsub.s32 0, %v311_v37  ;;  %v353_v5 = vadd.s32 3, %v336_v63  ;;  %v508_v11 = vand.u32 3, %v336_v63  ;;  %826 = vmatpush.msrb.mxu0 %v804_v60 }
  0xdf   :  { %v314_v39 = vsel %vm312_vm10, %v313_v38, %v311_v37  ;;  %v354_v12 = vand.u32 3, %v353_v5  ;;  %vm509_vm14 = vcmp.lt.s32.totalorder %v508_v11, 2  ;;  %vm510_vm15 = vcmp.eq.s32.totalorder %v508_v11, 0  ;;  %v702_v38 = vld [vmem:[#allocation13] sm:$0xf] }
  0xe0   :  { %v315_v40 = vclz %v314_v39  ;;  %vm513_vm0 = vcmp.eq.s32.totalorder %v508_v11, 2  ;;  %885 = vmatpush.msk.msrb.mxu3 %vm713_vm7, %v702_v38  ;;  %v918_v39 = vld [vmem:[#allocation11] ss:$0 sm:$0xff]  ;;  %vm758_vm10 = vcmask 523264  }
  0xe1   :  { %vm355_vm2 = vcmp.lt.s32.totalorder %v354_v12, 2  ;;  %vm356_vm3 = vcmp.eq.s32.totalorder %v354_v12, 0  ;;  %vm359_vm4 = vcmp.eq.s32.totalorder %v354_v12, 2  ;;  %v801_v12 = vld [vmem:[%s1534_s16 + $0x20] sm:$0xff] }
  0xe2   :  { %v872_v41 = vadd.s32 4294967294, %v315_v40 }
  0xe4   :  { %vm873_vm11 = vcmp.lt.s32.totalorder %v872_v41, 0 }
  0xe5   :  { %v318_v16 = vsel %vm873_vm11, 0, %v872_v41 }
  0xe6   :  { %v319_v43 = vsub.s32 32, %v318_v16  ;;  %v323_v44 = vsub.s32 4294967266, %v318_v16  ;;  %v320_v45 = vshll.u32 %v311_v37, %v318_v16  ;;  %v605_v37 = vld [vmem:[#allocation14] sm:$0xff] }
  0xe7   :  { %651 = vmatpush.msrb.mxu1 %v605_v37  ;;  %v699_v16 = vld [vmem:[%s1521_s3] sm:$0xff] }
  0xe8   :  { %v321_v46 = vshrl.u32 %v303_v42, %v319_v43  ;;  %v324_v34 = vadd.s32 127, %v323_v44  ;;  %886 = vmatmul.msk.f32.vlgmr.msrb.gmra.mxu3 %vm703_vm9, %v699_v16  ;;  %v700_v42 = vld [vmem:[%s1521_s3 + $0x8] sm:$0xff]  ;;  %v701_v43 = vld [vmem:[%s1521_s3 + $0x10] sm:$0xff]  ;;  %v753_v44 = vld [vmem:[%s1532_s14 + $0x38] sm:$0xff] }
  0xea   :  { %v322_v47 = vor.u32 %v321_v46, %v320_v45  ;;  %v325_v48 = vshll.u32 %v324_v34, 23  ;;  %v752_v45 = vld [vmem:[%s1532_s14 + $0x30] sm:$0xff]  ;;  %v751_v46 = vld [vmem:[%s1532_s14 + $0x28] sm:$0xff] }
  0xec   :  { %v326_v49 = vor.u32 4788187, %v325_v48  ;;  %v329_v51 = vcvt.s32.f32 %v322_v47  ;;  %v919_v47 = vld [vmem:[#allocation17] ss:$0 sm:$0xff] }
  0xee   :  { %v327_v50 = vand.u32 2147483647, %v326_v49 }
  0xf0   :  { %v330_v52 = vmul.f32 %v329_v51, %v327_v50  ;;  %887 = vmatmul.msk.f32.gmra.mxu3 %vm703_vm9, %v700_v42  ;;  %v661_v51 = vld [vmem:[%s1543_s13] sm:$0xff] }
  0xf2   :  { %v331_v53 = vxor.u32 2147483648, %v330_v52 }
  0xf4   :  { %v332_v54 = vsel %vm211_vm12, %v331_v53, %v330_v52  ;;  %v662_v52 = vld [vmem:[%s1543_s13 + $0x8] sm:$0xff]  ;;  %v663_v53 = vld [vmem:[%s1543_s13 + $0x10] sm:$0xff] }
  0xf5   :  { %v335_v56 = vsel %vm210_vm13, %v1366_v6, %v332_v54  ;;  %v574_v6 = vld [vmem:[%s1526_s8 + $0x8] sm:$0xff]  ;;  %v750_v54 = vld [vmem:[%s1532_s14 + $0x20] sm:$0xff] }
  0xf6   :  { %v337_v57 = vmul.f32 %v335_v56, %v335_v56  ;;  %599 = vmatpush.msra.mxu2 %v574_v6 }
  0xf8   :  { %v338_v58 = vmul.f32 -0.001358992, %v337_v57  ;;  %v345_v59 = vmul.f32 -0.00019511016, %v337_v57  ;;  %600 = vmatpush.msra.mxu2 %v573_v27  ;;  %888 = vmatmul.msk.f32.gmra.mxu3 %vm703_vm9, %v701_v43  ;;  %v921_v27 = vld [vmem:[%s1535_s17] ss:$0 sm:$0xff] }
  0xfa   :  { %v339_v61 = vadd.f32 0.041655596, %v338_v58  ;;  %v346_v62 = vadd.f32 0.008332121, %v345_v59  ;;  %776 = vmatpush.msrb.mxu2 %v753_v44  ;;  %v746_v58 = vld [vmem:[%s1532_s14] sm:$0xff] }
  0xfc   :  { %v340_v1 = vmul.f32 %v339_v61, %v337_v57  ;;  %v347_v2 = vmul.f32 %v346_v62, %v337_v57  ;;  %777 = vmatpush.msrb.mxu2 %v752_v45  ;;  %v803_v61 = vld [vmem:[%s1534_s16 + $0x30] sm:$0xff]  ;;  %v802_v62 = vld [vmem:[%s1534_s16 + $0x28] sm:$0xff] }
  0xfd   :  { %827 = vmatpush.msrb.mxu0 %v803_v61 }
  0xfe   :  { %v341_v3 = vadd.f32 -0.4999988, %v340_v1  ;;  %v348_v4 = vadd.f32 -0.16666654, %v347_v2  ;;  %778 = vmatpush.msrb.mxu2 %v751_v46 }
  0xff   :  { %828 = vmatpush.msrb.mxu0 %v802_v62 }
 0x100   :  { %v342_v7 = vmul.f32 %v341_v3, %v337_v57  ;;  %v349_v8 = vmul.f32 %v348_v4, %v337_v57  ;;  %779 = vmatpush.msrb.mxu2 %v750_v54  ;;  %v747_v57 = vld [vmem:[%s1532_s14 + $0x8] sm:$0xff] }
 0x101   :  { %829 = vmatpush.msrb.mxu0 %v801_v12 }
 0x102   :  { %v343_v10 = vadd.f32 1.0, %v342_v7  ;;  %v350_v9 = vadd.f32 1.0, %v349_v8  ;;  %780 = vmatpush.msrb.mxu2 %v749_v55 }
 0x104   :  { %v351_v13 = vmul.f32 %v350_v9, %v335_v56  ;;  %v360_v14 = vxor.u32 2147483648, %v343_v10  ;;  %v748_v56 = vld [vmem:[%s1532_s14 + $0x10] sm:$0xff] }
 0x105   :  { %781 = vmatpush.msrb.mxu2 %v748_v56 }
 0x106   :  { %v357_v15 = vxor.u32 2147483648, %v351_v13  ;;  %v515_v20 = vsel %vm513_vm0, %v360_v14, %v351_v13  ;;  %v361_v22 = vsel %vm359_vm4, %v360_v14, %v351_v13  ;;  %v800_v13 = vld [vmem:[%s1534_s16 + $0x18] sm:$0xff]  ;;  %v799_v14 = vld [vmem:[%s1534_s16 + $0x10] sm:$0xff] }
 0x107   :  { %782 = vmatpush.msrb.mxu2 %v747_v57  ;;  %830 = vmatpush.msrb.mxu0 %v800_v13 }
 0x108   :  { %v512_v19 = vsel %vm510_vm15, %v343_v10, %v357_v15  ;;  %v358_v21 = vsel %vm356_vm3, %v343_v10, %v357_v15  ;;  %v798_v15 = vld [vmem:[%s1534_s16 + $0x8] sm:$0xff] }
 0x109   :  { %v516_v23 = vsel %vm509_vm14, %v512_v19, %v515_v20  ;;  %v362_v24 = vsel %vm355_vm2, %v358_v21, %v361_v22  ;;  %783 = vmatpush.msrb.mxu2 %v746_v58  ;;  %831 = vmatpush.msrb.mxu0 %v799_v14  ;;  %v797_v19 = vld [vmem:[%s1534_s16] sm:$0xff] }
 0x10a   :  { %v517_v25 = vsel %vm352_vm5, nan, %v516_v23  ;;  %v363_v26 = vsel %vm352_vm5, nan, %v362_v24  ;;  %v920_v20 = vld [vmem:[%s1533_s15] ss:$0 sm:$0xff] }
 0x10b   :  { %877 = vmatmul.msk.f32.vlgmr.msra.gmra.mxu0 %vm520_vm1, %v517_v25  ;;  %878 = vmatmul.msk.f32.vlgmr.msra.gmra.mxu1 %vm520_vm1, %v363_v26 }
 0x10c   :  { %832 = vmatpush.msrb.mxu0 %v798_v15 }
 0x10e   :  { %833 = vmatpush.msrb.mxu0 %v797_v19 }
 0x156   :  { %v629_v34 = vpop.f32.mrf.mxu3 }
 0x16b   :  { %v734_v59 = vpop.f32.mrf.mxu3 }
 0x173   :  { %v737_v2 = vpop.f32.mrf.mxu3 }
 0x17b   :  { %v740_v7 = vpop.f32.mrf.mxu3 }
 0x188   :  { %v541_v30 = vpop.f32.mrf.mxu0  ;;  %v564_v31 = vpop.f32.mrf.mxu1 }
 0x189   :  { %v565_v32 = vadd.f32 %v564_v31, %v541_v30 }
 0x18b   :  { %v571_v33 = vadd.f32 %v917_v29, %v565_v32 }
 0x18d   :  { %922 = vtanh.f32 %v571_v33 }
 0x193   :  { %v923_v35 = vpop.eup %922 }
 0x194   :  { %879 = vmatmul.msk.f32.vlgmr.msra.gmra.mxu2 %vm581_vm6, %v923_v35 }
 0x217   :  { %v602_v40 = vpop.f32.mrf.mxu2 }
 0x218   :  { %v603_v41 = vadd.f32 %v918_v39, %v602_v40 }
 0x21a   :  { %881 = vmatmul.msk.f32.vlgmr.msrb.gmra.mxu1 %vm632_vm8, %v603_v41 }
 0x297   :  { %v653_v48 = vpop.f32.mrf.mxu1 }
 0x298   :  { %v654_v49 = vadd.f32 %v653_v48, %v629_v34 }
 0x29a   :  { %v660_v50 = vadd.f32 %v919_v47, %v654_v49 }
 0x29c   :  { %688 = vmatpush.msra.mxu1 %v660_v50 }
 0x29d   :  { %882 = vmatmul.msk.f32.vlgmr.msra.gmra.mxu1 %vm520_vm1, %v661_v51 }
 0x2a5   :  { %883 = vmatmul.msk.f32.gmra.mxu1 %vm520_vm1, %v662_v52 }
 0x2ad   :  { %884 = vmatmul.msk.f32.gmra.mxu1 %vm520_vm1, %v663_v53 }
 0x31a   :  { %v690_v63 = vpop.f32.mrf.mxu1 }
 0x31b   :  { %v735_v1 = vadd.f32 %v734_v59, %v690_v63 }
 0x31d   :  { %924 = vtanh.f32 %v735_v1 }
 0x322   :  { %v693_v3 = vpop.f32.mrf.mxu1 }
 0x323   :  { %v925_v4 = vpop.eup %924  ;;  %v738_v5 = vadd.f32 %v737_v2, %v693_v3 }
 0x324   :  { %889 = vmatmul.msk.f32.vlgmr.msrb.gmra.mxu2 %vm758_vm10, %v925_v4 }
 0x325   :  { %926 = vtanh.f32 %v738_v5 }
 0x32a   :  { %v696_v8 = vpop.f32.mrf.mxu1 }
 0x32b   :  { %v927_v10 = vpop.eup %926  ;;  %v741_v9 = vadd.f32 %v740_v7, %v696_v8 }
 0x32c   :  { %890 = vmatmul.msk.f32.gmra.mxu2 %vm758_vm10, %v927_v10 }
 0x32d   :  { %928 = vtanh.f32 %v741_v9 }
 0x333   :  { %v929_v11 = vpop.eup %928 }
 0x334   :  { %891 = vmatmul.msk.f32.gmra.mxu2 %vm758_vm10, %v929_v11 }
 0x3a7   :  { %v785_v21 = vpop.f32.mrf.mxu2 }
 0x3a8   :  { %v786_v22 = vadd.f32 %v920_v20, %v785_v21 }
 0x3aa   :  { %930 = vtanh.f32 %v786_v22 }
 0x3af   :  { %v788_v23 = vpop.f32.mrf.mxu2 }
 0x3b0   :  { %v931_v24 = vpop.eup %930  ;;  %v789_v25 = vadd.f32 %v920_v20, %v788_v23 }
 0x3b1   :  { %892 = vmatmul.msk.f32.vlgmr.msrb.gmra.mxu0 %vm758_vm10, %v931_v24 }
 0x3b2   :  { %932 = vtanh.f32 %v789_v25 }
 0x3b7   :  { %v791_v26 = vpop.f32.mrf.mxu2 }
 0x3b8   :  { %v933_v17 = vpop.eup %932  ;;  %v792_v18 = vadd.f32 %v920_v20, %v791_v26 }
 0x3b9   :  { %893 = vmatmul.msk.f32.gmra.mxu0 %vm758_vm10, %v933_v17 }
 0x3ba   :  { %934 = vtanh.f32 %v792_v18 }
 0x3c0   :  { %v935_v6 = vpop.eup %934 }
 0x3c1   :  { %894 = vmatmul.msk.f32.gmra.mxu0 %vm758_vm10, %v935_v6 }
 0x42e   :  { %v835_v28 = vpop.f32.mrf.mxu0 }
 0x42f   :  { %v836_v0 = vadd.f32 %v921_v27, %v835_v28 }
 0x431   :  { %844 = vst [vmem:[#allocation19] sm:$0xff] %v836_v0 }
 0x436   :  { %v838_v29 = vpop.f32.mrf.mxu0 }
 0x437   :  { %v839_v30 = vadd.f32 %v921_v27, %v838_v29 }
 0x439   :  { %845 = vst [vmem:[#allocation19 + $0x8] sm:$0xff] %v839_v30 }
 0x43e   :  { %v841_v31 = vpop.f32.mrf.mxu0 }
 0x43f   :  { %v842_v32 = vadd.f32 %v921_v27, %v841_v31 }
 0x441   :  { %846 = vst [vmem:[#allocation19 + $0x10] sm:$0xff] %v842_v32 }
 0x442   :  { %859 = dma.vmem_to_hbm [thread:$0]  %s852_s5, 384, %s854_s20, [#allocation4], %s1218_s30, %s1218_s30, %s1219_s0  }
 0x443   :  { %1212 = dma.done.wait [#allocation4], 384  }
 0x444   :  { %1213 = vsyncadd [#allocation4], 4294966912 }
 0x445   :  { %864 = vsyncpa [#allocation3], 1 }
 0x446   :  { %865 = vsyncpa [#allocation6], 1 }
 0x447   :  { %866 = vsyncpa [#allocation9], 1 }
 0x448   :  { %867 = vsyncpa [#allocation12], 1 }
 0x449   :  { %868 = vsyncpa [#allocation15], 1 }
 0x44a   :  { %869 = vsyncpa [#allocation18], 1 }
 0x44b   :  { %870 = vsyncpa [#allocation4], 1 }

</bundles_post_ra>
